<compile_context>
chip_gen: v5e
topology: v5e:2x2
jax: 0.10.0
libtpu: 0.0.40
codegen_flags: <defaults>
</compile_context>

<pallas_src>
from functools import partial

import jax
import jax.numpy as jnp
import numpy as np
from jax.experimental import pallas as pl
from jax.experimental.pallas import tpu as pltpu

EPS = 1e-5
# Flip to jnp.bfloat16 on v6e/v7x for ~2x MXU throughput (f32 accumulation kept);
# left at f32 so the numerical check stays tight (see review correctness note).
MATMUL_DTYPE = jnp.float32


# --------------------------------------------------------------------- VMEM budgets
def _tpu_vmem_bytes():
    try:
        return int(pltpu.get_tpu_info().vmem_capacity_bytes)
    except Exception:
        return 64 * 1024 * 1024   # conservative fallback (safe on every generation)


_VMEM_CAP = _tpu_vmem_bytes()
_VMEM_LIMIT = min((_VMEM_CAP * 5) // 8, 100 * 1024 * 1024)   # ~40 MiB v7x, ~80 MiB v5e/v6e
_TILE_BUDGET = max(8 * 1024 * 1024, _VMEM_LIMIT // 3)        # ~13 MiB v7x, ~26 MiB v6e


def _cparams(*sem):
    return pltpu.CompilerParams(dimension_semantics=sem,
                                vmem_limit_bytes=_VMEM_LIMIT)


def _round_up(x, m):
    return ((x + m - 1) // m) * m


def _divisors(n):
    return [d for d in range(1, n + 1) if n % d == 0]


def _pick_h_tile(h, w, cin, cout):
    """Largest H-band (divisor of h) whose working set fits the VMEM tile budget.
    Includes double-buffered I/O, weights, padded-band scratch, im2col patch and
    the f32 result, with lane padding for channel dims < 128."""
    cin_p = _round_up(cin, 128)
    cout_p = _round_up(cout, 128)
    k_p = _round_up(9 * cin, 128)

    def need(th):
        b = 2 * th * w * cin_p              # double-buffered body band
        b += 4 * w * cin_p                  # 1-row halos (2 specs x 2 buffers)
        b += 2 * 9 * cin * cout_p           # weight block
        b += (th + 2) * (w + 2) * cin_p     # padded-band scratch
        b += th * w * k_p                   # im2col patch
        b += 3 * th * w * cout_p            # f32 result + double-buffered output
        return 4 * b

    fit = [t for t in _divisors(h) if need(t) <= _TILE_BUDGET]
    if not fit:
        return 1
    aligned = [t for t in fit if (t * w) % 256 == 0]   # MXU M-alignment (v6e/v7x)
    return max(aligned) if aligned else max(fit)


def _pick_rows(rows, lanes):
    """Row tile for lane-dense elementwise passes: VMEM-aware, keeps (8,128) legality."""
    cap = max(1, _TILE_BUDGET // (16 * lanes))           # 4 f32 blocks in flight
    if rows <= cap:
        return rows
    cand = [t for t in _divisors(rows) if t % 8 == 0 and t <= cap]
    if cand:
        return max(cand)
    return 8 if rows % 8 == 0 else rows


def _pick_band(h2, lanes, h1):
    """Output-row tile for the upsample height pass."""
    per = 4 * (4 * lanes + 2 * h1)
    cap = max(1, (_TILE_BUDGET - 8 * h1 * lanes) // per)
    if h2 <= cap:
        return h2
    cand = [t for t in _divisors(h2) if t % 8 == 0 and t <= cap]
    if cand:
        return max(cand)
    return 8 if h2 % 8 == 0 else h2


# --------------------------------------------------------------------------- kernels
def _upsample_w_kernel(x_ref, aw_ref, o_ref):
    """Width-direction bilinear interp for one NHWC image.
    x_ref: (H1, W1, C), aw_ref: (W2, W1), o_ref: (H1, W2, C)."""
    h1 = x_ref.shape[0]
    aw = aw_ref[...]

    def body(h, carry):
        o_ref[h] = jnp.dot(aw, x_ref[h], preferred_element_type=jnp.float32)
        return carry

    jax.lax.fori_loop(0, h1, body, 0, unroll=True)


def _upsample_h_kernel(xw_ref, ah_ref, o_ref):
    """Height-direction bilinear interp as one lane-dense matmul.
    xw_ref: (H1, W2*C), ah_ref: (TR, H1), o_ref: (TR, W2*C)."""
    o_ref[...] = jnp.dot(ah_ref[...], xw_ref[...], preferred_element_type=jnp.float32)


def _conv_stats_kernel(xm_ref, xt_ref, xb_ref, w_ref, sc_ref, sh_ref,
                       y_ref, stats_ref, pad_ref, *, apply_act):
    """3x3 conv (bias folded away by train-mode BN) on one (batch, H-band) tile plus
    BatchNorm partial statistics.  Optionally applies the previous layer's folded
    BN scale/shift + ReLU to the loaded band (fused mid-layer activation).

    xm_ref   : (TH, W, Cin)     band rows
    xt_ref   : (1,  W, Cin)     row above the band (zeroed at the image top)
    xb_ref   : (1,  W, Cin)     row below the band (zeroed at the image bottom)
    w_ref    : (9*Cin, Cout)    weights reshaped for im2col
    sc_ref   : (1, 1, Cin)      folded BN scale of the previous layer (if apply_act)
    sh_ref   : (1, 1, Cin)      folded BN shift of the previous layer (if apply_act)
    y_ref    : (TH*W, Cout)     pre-BN conv output for this tile
    stats_ref: (2, Cout)        [sum, centered sum-of-squares] over this tile
    pad_ref  : (TH+2, W+2, Cin) VMEM scratch holding the zero-padded band
    """
    th, w_sp, cin = xm_ref.shape
    j = pl.program_id(1)
    nj = pl.num_programs(1)

    if apply_act:
        sc = sc_ref[...]
        sh = sh_ref[...]

        def act(v):
            return jnp.maximum(v * sc + sh, 0.0)
    else:
        def act(v):
            return v

    # Assemble the zero-padded band in VMEM.  The previous-layer activation is applied
    # *before* padding so the pad stays exactly zero (matches Conv2d(padding=1) on the
    # post-ReLU feature map).  Halo rows are masked to zero at the image border.
    zero_col = jnp.zeros((th + 2, 1, cin), jnp.float32)
    pad_ref[:, 0:1, :] = zero_col
    pad_ref[:, w_sp + 1:w_sp + 2, :] = zero_col
    pad_ref[0:1, 1:w_sp + 1, :] = act(xt_ref[...]) * (j > 0).astype(jnp.float32)
    pad_ref[1:th + 1, 1:w_sp + 1, :] = act(xm_ref[...])
    pad_ref[th + 1:th + 2, 1:w_sp + 1, :] = (
        act(xb_ref[...]) * (j < nj - 1).astype(jnp.float32))

    # im2col: 9 shifted tap views concatenated on lanes -> ONE K = 9*Cin MXU matmul.
    xb = pad_ref[...]
    taps = [xb[dy:dy + th, dx:dx + w_sp, :] for dy in range(3) for dx in range(3)]
    patch = jnp.concatenate(taps, axis=-1).reshape(th * w_sp, 9 * cin)
    y = jnp.dot(patch.astype(MATMUL_DTYPE), w_ref[...].astype(MATMUL_DTYPE),
                preferred_element_type=jnp.float32)
    y_ref[...] = y

    # Per-tile BN partials: sum and centered sum-of-squares (combined with Chan's
    # formula in the wrapper -> no E[x^2]-E[x]^2 cancellation).
    s = jnp.sum(y, axis=0, keepdims=True)
    mean_t = s * (1.0 / (th * w_sp))
    d = y - mean_t
    m2 = jnp.sum(d * d, axis=0, keepdims=True)
    stats_ref[...] = jnp.concatenate([s, m2], axis=0)


def _bn_relu_kernel(y_ref, scale_ref, shift_ref, o_ref):
    """Folded BatchNorm (scale/shift) + ReLU on a lane-dense (rows, W*C) tile."""
    o_ref[...] = jnp.maximum(y_ref[...] * scale_ref[...] + shift_ref[...], 0.0)


# --------------------------------------------------------------------------- wrappers
def _interp_matrix(n_in, n_out):
    """(n_out, n_in) bilinear interpolation matrix, align_corners=True (PyTorch)."""
    m = np.zeros((n_out, n_in), np.float32)
    if n_in == 1:
        m[:, 0] = 1.0
        return jnp.asarray(m)
    src = np.arange(n_out, dtype=np.float64) * (n_in - 1) / (n_out - 1)
    lo = np.clip(np.floor(src).astype(np.int64), 0, n_in - 2)
    frac = src - lo
    rows = np.arange(n_out)
    m[rows, lo] = 1.0 - frac
    m[rows, lo + 1] += frac
    return jnp.asarray(m)


def bilinear_upsample_x2_nhwc(x_nchw):
    """Pallas bilinear 2x upsample (align_corners=True).  (N,C,H,W) -> (N,2H,2W,C)."""
    n, c, h1, w1 = x_nchw.shape
    h2, w2 = 2 * h1, 2 * w1
    aw = _interp_matrix(w1, w2)                               # (W2, W1)
    ah = _interp_matrix(h1, h2)                               # (H2, H1)
    # One cheap transpose of the *small* pre-upsample tensor; everything downstream is NHWC.
    x_nhwc = jnp.transpose(x_nchw, (0, 2, 3, 1)).astype(jnp.float32)

    # Pass 1: width interpolation (per-row matmuls, AW stays resident in vregs).
    xw = pl.pallas_call(
        _upsample_w_kernel,
        grid=(n,),
        in_specs=[pl.BlockSpec((None, h1, w1, c), lambda i: (i, 0, 0, 0)),
                  pl.BlockSpec((w2, w1), lambda i: (0, 0))],
        out_specs=pl.BlockSpec((None, h1, w2, c), lambda i: (i, 0, 0, 0)),
        out_shape=jax.ShapeDtypeStruct((n, h1, w2, c), jnp.float32),
        compiler_params=_cparams("parallel"),
    )(x_nhwc, aw)

    # Pass 2: height interpolation as one (TR,H1)x(H1,W2*C) matmul per band,
    # writing lane-dense NHWC rows directly.
    lanes = w2 * c
    xw2 = xw.reshape(n, h1, lanes)                            # free (same element order)
    tr = _pick_band(h2, lanes, h1)
    out = pl.pallas_call(
        _upsample_h_kernel,
        grid=(n, h2 // tr),
        in_specs=[pl.BlockSpec((None, h1, lanes), lambda i, j: (i, 0, 0)),
                  pl.BlockSpec((tr, h1), lambda i, j: (j, 0))],
        out_specs=pl.BlockSpec((None, tr, lanes), lambda i, j: (i, j, 0)),
        out_shape=jax.ShapeDtypeStruct((n, h2, lanes), jnp.float32),
        compiler_params=_cparams("parallel", "parallel"),
    )(xw2, ah)
    return out.reshape(n, h2, w2, c)


def _conv3x3_stats(x_nhwc, w, in_scale, in_shift, h_tile=None):
    """3x3 conv (pad=1, bias folded away by train-mode BN) over (batch, H-band) grid.
    If in_scale/in_shift are given, the previous layer's BN+ReLU is applied to the
    loaded input band in-kernel.  Returns (pre-BN output NHWC, batch mean, batch var)."""
    n, h, w_sp, cin = x_nhwc.shape
    cout = w.shape[-1]
    th = h_tile if h_tile is not None else _pick_h_tile(h, w_sp, cin, cout)
    assert h % th == 0, (h, th)
    ht = h // th

    x = x_nhwc.astype(jnp.float32)
    w2d = w.reshape(9 * cin, cout).astype(jnp.float32)
    apply_act = in_scale is not None
    if apply_act:
        sc = in_scale.reshape(1, 1, cin).astype(jnp.float32)
        sh = in_shift.reshape(1, 1, cin).astype(jnp.float32)
    else:
        sc = jnp.ones((1, 1, cin), jnp.float32)
        sh = jnp.zeros((1, 1, cin), jnp.float32)

    y4, stats = pl.pallas_call(
        partial(_conv_stats_kernel, apply_act=apply_act),
        grid=(n, ht),
        in_specs=[
            # body band + 1-row halos of the SAME array (no HBM duplication / stacking)
            pl.BlockSpec((None, th, w_sp, cin), lambda i, j: (i, j, 0, 0)),
            pl.BlockSpec((None, 1, w_sp, cin),
                         lambda i, j: (i, jnp.maximum(j * th - 1, 0), 0, 0)),
            pl.BlockSpec((None, 1, w_sp, cin),
                         lambda i, j: (i, jnp.minimum((j + 1) * th, h - 1), 0, 0)),
            pl.BlockSpec((9 * cin, cout), lambda i, j: (0, 0)),
            pl.BlockSpec((1, 1, cin), lambda i, j: (0, 0, 0)),
            pl.BlockSpec((1, 1, cin), lambda i, j: (0, 0, 0)),
        ],
        out_specs=(
            pl.BlockSpec((None, None, th * w_sp, cout), lambda i, j: (i, j, 0, 0)),
            pl.BlockSpec((None, None, 2, cout), lambda i, j: (i, j, 0, 0)),
        ),
        out_shape=(
            jax.ShapeDtypeStruct((n, ht, th * w_sp, cout), jnp.float32),
            jax.ShapeDtypeStruct((n, ht, 2, cout), jnp.float32),
        ),
        scratch_shapes=[pltpu.VMEM((th + 2, w_sp + 2, cin), jnp.float32)],
        compiler_params=_cparams("parallel", "parallel"),
    )(x, x, x, w2d, sc, sh)

    # Cross-tile BN statistics via Chan's parallel-variance combine.
    cnt = float(th * w_sp)
    total = float(n * h * w_sp)
    sums = stats[:, :, 0, :]                                  # (N, HT, Cout)
    m2s = stats[:, :, 1, :]
    mean = jnp.sum(sums, axis=(0, 1)) / total
    mean_t = sums / cnt
    m2 = jnp.sum(m2s, axis=(0, 1)) + cnt * jnp.sum(
        (mean_t - mean[None, None, :]) ** 2, axis=(0, 1))
    var = m2 / total

    y = y4.reshape(n, h, w_sp, cout)                          # free (same element order)
    return y, mean, var


def _bn_relu(y_nhwc, scale, shift):
    """Final folded BN + ReLU on a lane-dense (rows, W*C) view."""
    n, h, w_sp, c = y_nhwc.shape
    rows, lanes = n * h, w_sp * c
    y2 = y_nhwc.reshape(rows, lanes)
    sc = jnp.tile(scale.astype(jnp.float32), w_sp).reshape(1, lanes)
    sh = jnp.tile(shift.astype(jnp.float32), w_sp).reshape(1, lanes)
    tr = _pick_rows(rows, lanes)
    out = pl.pallas_call(
        _bn_relu_kernel,
        grid=(rows // tr,),
        in_specs=[pl.BlockSpec((tr, lanes), lambda i: (i, 0)),
                  pl.BlockSpec((1, lanes), lambda i: (0, 0)),
                  pl.BlockSpec((1, lanes), lambda i: (0, 0))],
        out_specs=pl.BlockSpec((tr, lanes), lambda i: (i, 0)),
        out_shape=jax.ShapeDtypeStruct((rows, lanes), jnp.float32),
        compiler_params=_cparams("parallel"),
    )(y2, sc, sh)
    return out.reshape(n, h, w_sp, c)


def double_conv_nhwc(x_nhwc, p, h_tile=None):
    """(Conv3x3 -> BN(train) -> ReLU) * 2.  Conv biases are dropped: a per-channel
    constant cancels exactly under training-mode BatchNorm."""
    y1, m1, v1 = _conv3x3_stats(x_nhwc, p["w1"], None, None, h_tile)
    s1 = p["g1"].astype(jnp.float32) * jax.lax.rsqrt(v1 + EPS)
    b1 = p["beta1"].astype(jnp.float32) - m1 * s1
    # conv2 applies BN1 + ReLU to its input band in-kernel (no standalone mid pass).
    y2, m2, v2 = _conv3x3_stats(y1, p["w2"], s1, b1, h_tile)
    s2 = p["g2"].astype(jnp.float32) * jax.lax.rsqrt(v2 + EPS)
    b2 = p["beta2"].astype(jnp.float32) - m2 * s2
    return _bn_relu(y2, s2, b2)


def up_forward(x1, x2, params, h_tile=None):
    """Pallas forward of `Up` (bilinear=True): upsample x1, pad, concat x2, DoubleConv."""
    x1u = bilinear_upsample_x2_nhwc(x1)                       # (N, 2H1, 2W1, C1) NHWC
    n, c2, h, w = x2.shape
    dy = h - x1u.shape[1]
    dx = w - x1u.shape[2]
    x1u = jnp.pad(x1u, ((0, 0), (dy // 2, dy - dy // 2),
                        (dx // 2, dx - dx // 2), (0, 0)))
    x2n = jnp.transpose(x2, (0, 2, 3, 1)).astype(jnp.float32)  # skip connection -> NHWC
    x = jnp.concatenate([x2n, x1u], axis=-1)                   # contiguous lane append
    y = double_conv_nhwc(x, params, h_tile)
    return jnp.transpose(y, (0, 3, 1, 2))                      # NHWC -> NCHW (module output)


# --------------------------------------------------------------------------- pure-JAX reference
def _ref_upsample_bilinear_x2(x):
    """Bilinear 2x upsample, align_corners=True, gather+lerp path (independent of kernel)."""
    _, _, h, w = x.shape
    h2, w2 = 2 * h, 2 * w

    def coords(n_in, n_out):
        if n_in == 1:
            return np.zeros(n_out, np.int64), np.zeros(n_out, np.float32)
        src = np.arange(n_out, dtype=np.float64) * (n_in - 1) / (n_out - 1)
        lo = np.clip(np.floor(src).astype(np.int64), 0, n_in - 2)
        return lo, (src - lo).astype(np.float32)

    hlo, hf = coords(h, h2)
    wlo, wf = coords(w, w2)
    hf = jnp.asarray(hf)[None, None, :, None]
    wf = jnp.asarray(wf)[None, None, None, :]
    xh = x[:, :, hlo, :] * (1.0 - hf) + x[:, :, hlo + 1, :] * hf
    return xh[:, :, :, wlo] * (1.0 - wf) + xh[:, :, :, wlo + 1] * wf


def _ref_conv_bn_relu(x, w, b, gamma, beta):
    y = jax.lax.conv_general_dilated(
        x, jnp.transpose(w, (3, 2, 0, 1)), (1, 1), ((1, 1), (1, 1)),
        dimension_numbers=("NCHW", "OIHW", "NCHW"))
    y = y + b[None, :, None, None]
    mean = jnp.mean(y, axis=(0, 2, 3), keepdims=True)
    var = jnp.mean((y - mean) ** 2, axis=(0, 2, 3), keepdims=True)
    y = (y - mean) * jax.lax.rsqrt(var + EPS)
    y = y * gamma[None, :, None, None] + beta[None, :, None, None]
    return jnp.maximum(y, 0.0)


def _ref_up(x1, x2, p):
    x1u = _ref_upsample_bilinear_x2(x1)
    dy = x2.shape[2] - x1u.shape[2]
    dx = x2.shape[3] - x1u.shape[3]
    x1u = jnp.pad(x1u, ((0, 0), (0, 0),
                        (dy // 2, dy - dy // 2), (dx // 2, dx - dx // 2)))
    x = jnp.concatenate([x2, x1u], axis=1)
    y = _ref_conv_bn_relu(x, p["w1"], p["b1"], p["g1"], p["beta1"])
    return _ref_conv_bn_relu(y, p["w2"], p["b2"], p["g2"], p["beta2"])


# --------------------------------------------------------------------------- test
if __name__ == "__main__":
    # Up(in_channels=8, out_channels=8, bilinear=True):
    #   x1: (2, 4, 8, 8)   decoder feature (upsampled 2x)
    #   x2: (2, 4, 16, 16) skip connection
    #   concat -> 8 channels; DoubleConv(8, 8, mid_channels=4).
    N, C1, C2 = 2, 4, 4
    H1 = W1 = 8
    H2 = W2 = 16
    CIN, CMID, COUT = C1 + C2, (C1 + C2) // 2, 8

    key = jax.random.PRNGKey(0)
    ks = jax.random.split(key, 10)
    x1 = jax.random.normal(ks[0], (N, C1, H1, W1), jnp.float32)
    x2 = jax.random.normal(ks[1], (N, C2, H2, W2), jnp.float32)

    s1, s2 = 1.0 / np.sqrt(CIN * 9), 1.0 / np.sqrt(CMID * 9)
    params = {
        "w1": jax.random.uniform(ks[2], (3, 3, CIN, CMID), jnp.float32, -s1, s1),
        "b1": jax.random.uniform(ks[3], (CMID,), jnp.float32, -s1, s1),
        "g1": 1.0 + 0.1 * jax.random.normal(ks[4], (CMID,), jnp.float32),
        "beta1": 0.1 * jax.random.normal(ks[5], (CMID,), jnp.float32),
        "w2": jax.random.uniform(ks[6], (3, 3, CMID, COUT), jnp.float32, -s2, s2),
        "b2": jax.random.uniform(ks[7], (COUT,), jnp.float32, -s2, s2),
        "g2": 1.0 + 0.1 * jax.random.normal(ks[8], (COUT,), jnp.float32),
        "beta2": 0.1 * jax.random.normal(ks[9], (COUT,), jnp.float32),
    }

    # h_tile=8 forces multiple H-bands (grid (2, 2)) so the halo/tiling path is exercised.
    out = jax.block_until_ready(up_forward(x1, x2, params, h_tile=8))
    ref = jax.block_until_ready(_ref_up(x1, x2, params))

    assert out.shape == (N, COUT, H2, W2), out.shape
    err = float(jnp.max(jnp.abs(out - ref)))
    assert err < 5e-4, f"max abs err {err}"
    print("KERNEL_OK")
</pallas_src>

<mosaic_0001>
module attributes {stable_mosaic.version = 11 : i64} {
  func.func @_upsample_w_kernel(%arg0: i32, %arg1: memref<1x8x8x4xf32, #tpu.memory_space<vmem>>, %arg2: memref<16x8xf32, #tpu.memory_space<vmem>>, %arg3: memref<1x8x16x4xf32, #tpu.memory_space<vmem>>) attributes {dimension_semantics = [#tpu.dimension_semantics<parallel>], iteration_bounds = array<i64: 2>, scalar_prefetch = 0 : i64, scratch_operands = 0 : i64, tpu.core_type = #tpu.core_type<tc>, window_params = [{transform_indices = @transform_0, window_bounds = array<i64: 1, 8, 8, 4>}, {pipeline_mode = #tpu.pipeline_mode<synchronous>, transform_indices = @transform_1, window_bounds = array<i64: 16, 8>}, {transform_indices = @transform_2, window_bounds = array<i64: 1, 8, 16, 4>}]} {
    %c0 = arith.constant 0 : index
    %c0_0 = arith.constant 0 : index
    %0 = vector.load %arg2[%c0, %c0_0] : memref<16x8xf32, #tpu.memory_space<vmem>>, vector<16x8xf32>
    %c0_i32 = arith.constant 0 : i32
    %c0_1 = arith.constant 0 : index
    %1 = arith.index_cast %c0_i32 : i32 to index
    %c0_2 = arith.constant 0 : index
    %c0_3 = arith.constant 0 : index
    %2 = vector.load %arg1[%c0_1, %1, %c0_2, %c0_3] : memref<1x8x8x4xf32, #tpu.memory_space<vmem>>, vector<1x1x8x4xf32>
    %3 = vector.shape_cast %2 : vector<1x1x8x4xf32> to vector<8x4xf32>
    %cst = arith.constant dense<0.000000e+00> : vector<16x4xf32>
    %4 = tpu.matmul %0, %3, %cst {dimension_numbers = #tpu.dot_dimension_numbers<[1], [0], [0], [1], [0, 0, 1, 1], [], []>} : vector<16x8xf32>, vector<8x4xf32>, vector<16x4xf32> -> vector<16x4xf32>
    %c0_4 = arith.constant 0 : index
    %5 = arith.index_cast %c0_i32 : i32 to index
    %c0_5 = arith.constant 0 : index
    %c0_6 = arith.constant 0 : index
    %6 = vector.load %arg3[%c0_4, %5, %c0_5, %c0_6] : memref<1x8x16x4xf32, #tpu.memory_space<vmem>>, vector<1x1x16x4xf32>
    %7 = vector.shape_cast %6 : vector<1x1x16x4xf32> to vector<16x4xf32>
    %8 = vector.shape_cast %4 : vector<16x4xf32> to vector<1x1x16x4xf32>
    tpu.vector_store %arg3[%c0_4, %5, %c0_5, %c0_6], %8 {strides = array<i32>} : memref<1x8x16x4xf32, #tpu.memory_space<vmem>>, vector<1x1x16x4xf32>,
    %c1_i32 = arith.constant 1 : i32
    %c0_7 = arith.constant 0 : index
    %9 = arith.index_cast %c1_i32 : i32 to index
    %c0_8 = arith.constant 0 : index
    %c0_9 = arith.constant 0 : index
    %10 = vector.load %arg1[%c0_7, %9, %c0_8, %c0_9] : memref<1x8x8x4xf32, #tpu.memory_space<vmem>>, vector<1x1x8x4xf32>
    %11 = vector.shape_cast %10 : vector<1x1x8x4xf32> to vector<8x4xf32>
    %cst_10 = arith.constant dense<0.000000e+00> : vector<16x4xf32>
    %12 = tpu.matmul %0, %11, %cst_10 {dimension_numbers = #tpu.dot_dimension_numbers<[1], [0], [0], [1], [0, 0, 1, 1], [], []>} : vector<16x8xf32>, vector<8x4xf32>, vector<16x4xf32> -> vector<16x4xf32>
    %c0_11 = arith.constant 0 : index
    %13 = arith.index_cast %c1_i32 : i32 to index
    %c0_12 = arith.constant 0 : index
    %c0_13 = arith.constant 0 : index
    %14 = vector.load %arg3[%c0_11, %13, %c0_12, %c0_13] : memref<1x8x16x4xf32, #tpu.memory_space<vmem>>, vector<1x1x16x4xf32>
    %15 = vector.shape_cast %14 : vector<1x1x16x4xf32> to vector<16x4xf32>
    %16 = vector.shape_cast %12 : vector<16x4xf32> to vector<1x1x16x4xf32>
    tpu.vector_store %arg3[%c0_11, %13, %c0_12, %c0_13], %16 {strides = array<i32>} : memref<1x8x16x4xf32, #tpu.memory_space<vmem>>, vector<1x1x16x4xf32>,
    %c2_i32 = arith.constant 2 : i32
    %c0_14 = arith.constant 0 : index
    %17 = arith.index_cast %c2_i32 : i32 to index
    %c0_15 = arith.constant 0 : index
    %c0_16 = arith.constant 0 : index
    %18 = vector.load %arg1[%c0_14, %17, %c0_15, %c0_16] : memref<1x8x8x4xf32, #tpu.memory_space<vmem>>, vector<1x1x8x4xf32>
    %19 = vector.shape_cast %18 : vector<1x1x8x4xf32> to vector<8x4xf32>
    %cst_17 = arith.constant dense<0.000000e+00> : vector<16x4xf32>
    %20 = tpu.matmul %0, %19, %cst_17 {dimension_numbers = #tpu.dot_dimension_numbers<[1], [0], [0], [1], [0, 0, 1, 1], [], []>} : vector<16x8xf32>, vector<8x4xf32>, vector<16x4xf32> -> vector<16x4xf32>
    %c0_18 = arith.constant 0 : index
    %21 = arith.index_cast %c2_i32 : i32 to index
    %c0_19 = arith.constant 0 : index
    %c0_20 = arith.constant 0 : index
    %22 = vector.load %arg3[%c0_18, %21, %c0_19, %c0_20] : memref<1x8x16x4xf32, #tpu.memory_space<vmem>>, vector<1x1x16x4xf32>
    %23 = vector.shape_cast %22 : vector<1x1x16x4xf32> to vector<16x4xf32>
    %24 = vector.shape_cast %20 : vector<16x4xf32> to vector<1x1x16x4xf32>
    tpu.vector_store %arg3[%c0_18, %21, %c0_19, %c0_20], %24 {strides = array<i32>} : memref<1x8x16x4xf32, #tpu.memory_space<vmem>>, vector<1x1x16x4xf32>,
    %c3_i32 = arith.constant 3 : i32
    %c0_21 = arith.constant 0 : index
    %25 = arith.index_cast %c3_i32 : i32 to index
    %c0_22 = arith.constant 0 : index
    %c0_23 = arith.constant 0 : index
    %26 = vector.load %arg1[%c0_21, %25, %c0_22, %c0_23] : memref<1x8x8x4xf32, #tpu.memory_space<vmem>>, vector<1x1x8x4xf32>
    %27 = vector.shape_cast %26 : vector<1x1x8x4xf32> to vector<8x4xf32>
    %cst_24 = arith.constant dense<0.000000e+00> : vector<16x4xf32>
    %28 = tpu.matmul %0, %27, %cst_24 {dimension_numbers = #tpu.dot_dimension_numbers<[1], [0], [0], [1], [0, 0, 1, 1], [], []>} : vector<16x8xf32>, vector<8x4xf32>, vector<16x4xf32> -> vector<16x4xf32>
    %c0_25 = arith.constant 0 : index
    %29 = arith.index_cast %c3_i32 : i32 to index
    %c0_26 = arith.constant 0 : index
    %c0_27 = arith.constant 0 : index
    %30 = vector.load %arg3[%c0_25, %29, %c0_26, %c0_27] : memref<1x8x16x4xf32, #tpu.memory_space<vmem>>, vector<1x1x16x4xf32>
    %31 = vector.shape_cast %30 : vector<1x1x16x4xf32> to vector<16x4xf32>
    %32 = vector.shape_cast %28 : vector<16x4xf32> to vector<1x1x16x4xf32>
    tpu.vector_store %arg3[%c0_25, %29, %c0_26, %c0_27], %32 {strides = array<i32>} : memref<1x8x16x4xf32, #tpu.memory_space<vmem>>, vector<1x1x16x4xf32>,
    %c4_i32 = arith.constant 4 : i32
    %c0_28 = arith.constant 0 : index
    %33 = arith.index_cast %c4_i32 : i32 to index
    %c0_29 = arith.constant 0 : index
    %c0_30 = arith.constant 0 : index
    %34 = vector.load %arg1[%c0_28, %33, %c0_29, %c0_30] : memref<1x8x8x4xf32, #tpu.memory_space<vmem>>, vector<1x1x8x4xf32>
    %35 = vector.shape_cast %34 : vector<1x1x8x4xf32> to vector<8x4xf32>
    %cst_31 = arith.constant dense<0.000000e+00> : vector<16x4xf32>
    %36 = tpu.matmul %0, %35, %cst_31 {dimension_numbers = #tpu.dot_dimension_numbers<[1], [0], [0], [1], [0, 0, 1, 1], [], []>} : vector<16x8xf32>, vector<8x4xf32>, vector<16x4xf32> -> vector<16x4xf32>
    %c0_32 = arith.constant 0 : index
    %37 = arith.index_cast %c4_i32 : i32 to index
    %c0_33 = arith.constant 0 : index
    %c0_34 = arith.constant 0 : index
    %38 = vector.load %arg3[%c0_32, %37, %c0_33, %c0_34] : memref<1x8x16x4xf32, #tpu.memory_space<vmem>>, vector<1x1x16x4xf32>
    %39 = vector.shape_cast %38 : vector<1x1x16x4xf32> to vector<16x4xf32>
    %40 = vector.shape_cast %36 : vector<16x4xf32> to vector<1x1x16x4xf32>
    tpu.vector_store %arg3[%c0_32, %37, %c0_33, %c0_34], %40 {strides = array<i32>} : memref<1x8x16x4xf32, #tpu.memory_space<vmem>>, vector<1x1x16x4xf32>,
    %c5_i32 = arith.constant 5 : i32
    %c0_35 = arith.constant 0 : index
    %41 = arith.index_cast %c5_i32 : i32 to index
    %c0_36 = arith.constant 0 : index
    %c0_37 = arith.constant 0 : index
    %42 = vector.load %arg1[%c0_35, %41, %c0_36, %c0_37] : memref<1x8x8x4xf32, #tpu.memory_space<vmem>>, vector<1x1x8x4xf32>
    %43 = vector.shape_cast %42 : vector<1x1x8x4xf32> to vector<8x4xf32>
    %cst_38 = arith.constant dense<0.000000e+00> : vector<16x4xf32>
    %44 = tpu.matmul %0, %43, %cst_38 {dimension_numbers = #tpu.dot_dimension_numbers<[1], [0], [0], [1], [0, 0, 1, 1], [], []>} : vector<16x8xf32>, vector<8x4xf32>, vector<16x4xf32> -> vector<16x4xf32>
    %c0_39 = arith.constant 0 : index
    %45 = arith.index_cast %c5_i32 : i32 to index
    %c0_40 = arith.constant 0 : index
    %c0_41 = arith.constant 0 : index
    %46 = vector.load %arg3[%c0_39, %45, %c0_40, %c0_41] : memref<1x8x16x4xf32, #tpu.memory_space<vmem>>, vector<1x1x16x4xf32>
    %47 = vector.shape_cast %46 : vector<1x1x16x4xf32> to vector<16x4xf32>
    %48 = vector.shape_cast %44 : vector<16x4xf32> to vector<1x1x16x4xf32>
    tpu.vector_store %arg3[%c0_39, %45, %c0_40, %c0_41], %48 {strides = array<i32>} : memref<1x8x16x4xf32, #tpu.memory_space<vmem>>, vector<1x1x16x4xf32>,
    %c6_i32 = arith.constant 6 : i32
    %c0_42 = arith.constant 0 : index
    %49 = arith.index_cast %c6_i32 : i32 to index
    %c0_43 = arith.constant 0 : index
    %c0_44 = arith.constant 0 : index
    %50 = vector.load %arg1[%c0_42, %49, %c0_43, %c0_44] : memref<1x8x8x4xf32, #tpu.memory_space<vmem>>, vector<1x1x8x4xf32>
    %51 = vector.shape_cast %50 : vector<1x1x8x4xf32> to vector<8x4xf32>
    %cst_45 = arith.constant dense<0.000000e+00> : vector<16x4xf32>
    %52 = tpu.matmul %0, %51, %cst_45 {dimension_numbers = #tpu.dot_dimension_numbers<[1], [0], [0], [1], [0, 0, 1, 1], [], []>} : vector<16x8xf32>, vector<8x4xf32>, vector<16x4xf32> -> vector<16x4xf32>
    %c0_46 = arith.constant 0 : index
    %53 = arith.index_cast %c6_i32 : i32 to index
    %c0_47 = arith.constant 0 : index
    %c0_48 = arith.constant 0 : index
    %54 = vector.load %arg3[%c0_46, %53, %c0_47, %c0_48] : memref<1x8x16x4xf32, #tpu.memory_space<vmem>>, vector<1x1x16x4xf32>
    %55 = vector.shape_cast %54 : vector<1x1x16x4xf32> to vector<16x4xf32>
    %56 = vector.shape_cast %52 : vector<16x4xf32> to vector<1x1x16x4xf32>
    tpu.vector_store %arg3[%c0_46, %53, %c0_47, %c0_48], %56 {strides = array<i32>} : memref<1x8x16x4xf32, #tpu.memory_space<vmem>>, vector<1x1x16x4xf32>,
    %c7_i32 = arith.constant 7 : i32
    %c0_49 = arith.constant 0 : index
    %57 = arith.index_cast %c7_i32 : i32 to index
    %c0_50 = arith.constant 0 : index
    %c0_51 = arith.constant 0 : index
    %58 = vector.load %arg1[%c0_49, %57, %c0_50, %c0_51] : memref<1x8x8x4xf32, #tpu.memory_space<vmem>>, vector<1x1x8x4xf32>
    %59 = vector.shape_cast %58 : vector<1x1x8x4xf32> to vector<8x4xf32>
    %cst_52 = arith.constant dense<0.000000e+00> : vector<16x4xf32>
    %60 = tpu.matmul %0, %59, %cst_52 {dimension_numbers = #tpu.dot_dimension_numbers<[1], [0], [0], [1], [0, 0, 1, 1], [], []>} : vector<16x8xf32>, vector<8x4xf32>, vector<16x4xf32> -> vector<16x4xf32>
    %c0_53 = arith.constant 0 : index
    %61 = arith.index_cast %c7_i32 : i32 to index
    %c0_54 = arith.constant 0 : index
    %c0_55 = arith.constant 0 : index
    %62 = vector.load %arg3[%c0_53, %61, %c0_54, %c0_55] : memref<1x8x16x4xf32, #tpu.memory_space<vmem>>, vector<1x1x16x4xf32>
    %63 = vector.shape_cast %62 : vector<1x1x16x4xf32> to vector<16x4xf32>
    %64 = vector.shape_cast %60 : vector<16x4xf32> to vector<1x1x16x4xf32>
    tpu.vector_store %arg3[%c0_53, %61, %c0_54, %c0_55], %64 {strides = array<i32>} : memref<1x8x16x4xf32, #tpu.memory_space<vmem>>, vector<1x1x16x4xf32>,
    %c8_i32 = arith.constant 8 : i32
    return
  }
  func.func @transform_0(%arg0: i32) -> (i32, i32, i32, i32) {
    %c0_i32 = arith.constant 0 : i32
    %c0_i32_0 = arith.constant 0 : i32
    %c0_i32_1 = arith.constant 0 : i32
    %c0_i32_2 = arith.constant 0 : i32
    return %arg0, %c0_i32, %c0_i32_0, %c0_i32_1 : i32, i32, i32, i32
  }
  func.func @transform_1(%arg0: i32) -> (i32, i32) {
    %c0_i32 = arith.constant 0 : i32
    %c0_i32_0 = arith.constant 0 : i32
    %c0_i32_1 = arith.constant 0 : i32
    return %c0_i32, %c0_i32_0 : i32, i32
  }
  func.func @transform_2(%arg0: i32) -> (i32, i32, i32, i32) {
    %c0_i32 = arith.constant 0 : i32
    %c0_i32_0 = arith.constant 0 : i32
    %c0_i32_1 = arith.constant 0 : i32
    %c0_i32_2 = arith.constant 0 : i32
    return %arg0, %c0_i32, %c0_i32_0, %c0_i32_1 : i32, i32, i32, i32
  }
}

</mosaic_0001>

<bundles_post_ra>
// kernel: tpu_custom_call.1
= control target key start
LH: loop header
LB: loop body
LE: loop exit
PB: predicated region body
PF: predicated region fallthrough
CT: control target
= control target key end

     0   :  { %s512_s9 = smov 0   ;;  %s589_s0 = inlined_call_operand.vmem [shape: f32[2,8,8,4], index: 0, kind: input, shape index: {}]   ;;  %s590_s1 = inlined_call_operand.vmem [shape: f32[16,8], index: 1, kind: input, shape index: {}]   ;;  %s591_s2 = inlined_call_operand.vmem [shape: f32[2,8,16,4], index: 2, kind: output, shape index: {}]  }
   0x1 LB: > { %s431_s10 = sadd.s32 4294967295, %s495_s9   ;;  %p435_p0 = scmp.ge.s32.totalorder %s495_s9, 1  ;;  %s495_s9 = sphi %s512_s9, %s12_s9  }
   0x2   : > { %p112_p1 = scmp.lt.s32.totalorder %s495_s9, 3 }
   0x4   : > { %p113_p2 = pnand %p435_p0, %p112_p1 }
   0x5   : > { %p134_p3 = scmp.lt.s32.totalorder (!%p113_p2), %s431_s10, 1 }
   0x6   : > { %116 = sbr.rel (%p113_p2) target bundleno = 174 (0xae), region = 28 }
   0xb   : > { %s593_s10 = smov (!%p134_p3, %s431_s10), 1  ;;  %v144_v0 = vld [vmem:[%s590_s1] sm:$0xff]  ;;  %vm147_vm0 = vcmask 64512   ;;  %v145_v9 = vld [vmem:[%s590_s1 + $0x8] sm:$0xff]  ;;  %vm177_vm1 = vcmask 31744  }
   0xc   : > { %s479_s11 = sshll.u32 %s593_s10, 6  ;;  %s480_s19 = sshll.u32 %s593_s10, 7 }
   0xd   : > { %s138_s14 = scalar_lea.vmem %s589_s0, %s479_s11  ;;  %s552_s22 = scalar_lea.vmem %s591_s2, %s480_s19 }
   0xe   : > { %v447_v1 = vld [vmem:[%s138_s14 + $0x10] sm:$0xff]  ;;  %v452_v2 = vld [vmem:[%s138_s14 + $0x18] sm:$0xff]  ;;  %v146_v5 = vld [vmem:[%s138_s14] sm:$0xff] }
   0xf   : > { %v467_v3 = vld [vmem:[%s138_s14 + $0x30] sm:$0xff]  ;;  %225 = vmatpush.msra.mxu2 %v447_v1  ;;  %253 = vmatpush.msra.mxu3 %v452_v2  ;;  %v472_v4 = vld [vmem:[%s138_s14 + $0x38] sm:$0xff]  ;;  %v442_v6 = vld [vmem:[%s138_s14 + $0x8] sm:$0xff] }
  0x10   : > { %448 = vmatmul.msk.f32.vlgmr.msra.gmra.mxu2 %vm147_vm0, %v144_v0  ;;  %453 = vmatmul.msk.f32.vlgmr.msra.gmra.mxu3 %vm147_vm0, %v144_v0  ;;  %v457_v7 = vld [vmem:[%s138_s14 + $0x20] sm:$0xff]  ;;  %v462_v8 = vld [vmem:[%s138_s14 + $0x28] sm:$0xff] }
  0x11   : > { %337 = vmatpush.msrb.mxu2 %v467_v3  ;;  %365 = vmatpush.msrb.mxu3 %v472_v4 }
  0x12   : > { %169 = vmatpush.msra.mxu0 %v146_v5  ;;  %197 = vmatpush.msra.mxu1 %v442_v6 }
  0x13   : > { %440 = vmatmul.msk.f32.vlgmr.msra.gmra.mxu0 %vm147_vm0, %v144_v0  ;;  %443 = vmatmul.msk.f32.vlgmr.msra.gmra.mxu1 %vm147_vm0, %v144_v0 }
  0x14   : > { %281 = vmatpush.msrb.mxu0 %v457_v7  ;;  %309 = vmatpush.msrb.mxu1 %v462_v8 }
  0x18   : > { %449 = vmatmul.msk.f32.gmra.mxu2 %vm147_vm0, %v145_v9  ;;  %454 = vmatmul.msk.f32.gmra.mxu3 %vm147_vm0, %v145_v9 }
  0x1b   : > { %441 = vmatmul.msk.f32.gmra.mxu0 %vm147_vm0, %v145_v9  ;;  %444 = vmatmul.msk.f32.gmra.mxu1 %vm147_vm0, %v145_v9 }
  0x20   : > { %468 = vmatmul.msk.f32.vlgmr.msrb.gmra.mxu2 %vm147_vm0, %v144_v0  ;;  %473 = vmatmul.msk.f32.vlgmr.msrb.gmra.mxu3 %vm147_vm0, %v144_v0 }
  0x23   : > { %458 = vmatmul.msk.f32.vlgmr.msrb.gmra.mxu0 %vm147_vm0, %v144_v0  ;;  %463 = vmatmul.msk.f32.vlgmr.msrb.gmra.mxu1 %vm147_vm0, %v144_v0 }
  0x28   : > { %469 = vmatmul.msk.f32.gmra.mxu2 %vm147_vm0, %v145_v9  ;;  %474 = vmatmul.msk.f32.gmra.mxu3 %vm147_vm0, %v145_v9 }
  0x2b   : > { %459 = vmatmul.msk.f32.gmra.mxu0 %vm147_vm0, %v145_v9  ;;  %464 = vmatmul.msk.f32.gmra.mxu1 %vm147_vm0, %v145_v9 }
  0x90   : > { %v171_v10 = vpop.f32.mrf.mxu0  ;;  %v199_v11 = vpop.f32.mrf.mxu1 }
  0x91   : > { %178 = vst.msk [vmem:[%s552_s22] sm:$0xff] %vm177_vm1, %v171_v10 }
  0x92   : > { %445 = vst.msk [vmem:[%s552_s22 + $0x10] sm:$0xff] %vm177_vm1, %v199_v11 }
  0x93   : > { %v227_v12 = vpop.f32.mrf.mxu2  ;;  %v255_v13 = vpop.f32.mrf.mxu3 }
  0x94   : > { %450 = vst.msk [vmem:[%s552_s22 + $0x20] sm:$0xff] %vm177_vm1, %v227_v12 }
  0x95   : > { %455 = vst.msk [vmem:[%s552_s22 + $0x30] sm:$0xff] %vm177_vm1, %v255_v13 }
  0x98   : > { %v174_v14 = vpop.f32.mrf.mxu0  ;;  %v202_v15 = vpop.f32.mrf.mxu1 }
  0x99   : > { %179 = vst.msk [vmem:[%s552_s22 + $0x8] sm:$0xff] %vm177_vm1, %v174_v14 }
  0x9a   : > { %446 = vst.msk [vmem:[%s552_s22 + $0x18] sm:$0xff] %vm177_vm1, %v202_v15 }
  0x9b   : > { %v230_v16 = vpop.f32.mrf.mxu2  ;;  %v258_v17 = vpop.f32.mrf.mxu3 }
  0x9c   : > { %451 = vst.msk [vmem:[%s552_s22 + $0x28] sm:$0xff] %vm177_vm1, %v230_v16 }
  0x9d   : > { %456 = vst.msk [vmem:[%s552_s22 + $0x38] sm:$0xff] %vm177_vm1, %v258_v17 }
  0xa0   : > { %v283_v18 = vpop.f32.mrf.mxu0  ;;  %v311_v19 = vpop.f32.mrf.mxu1 }
  0xa1   : > { %460 = vst.msk [vmem:[%s552_s22 + $0x40] sm:$0xff] %vm177_vm1, %v283_v18 }
  0xa2   : > { %465 = vst.msk [vmem:[%s552_s22 + $0x50] sm:$0xff] %vm177_vm1, %v311_v19 }
  0xa3   : > { %v339_v20 = vpop.f32.mrf.mxu2  ;;  %v367_v21 = vpop.f32.mrf.mxu3 }
  0xa4   : > { %470 = vst.msk [vmem:[%s552_s22 + $0x60] sm:$0xff] %vm177_vm1, %v339_v20 }
  0xa5   : > { %475 = vst.msk [vmem:[%s552_s22 + $0x70] sm:$0xff] %vm177_vm1, %v367_v21 }
  0xa8   : > { %v286_v22 = vpop.f32.mrf.mxu0  ;;  %v314_v23 = vpop.f32.mrf.mxu1 }
  0xa9   : > { %461 = vst.msk [vmem:[%s552_s22 + $0x48] sm:$0xff] %vm177_vm1, %v286_v22 }
  0xaa   : > { %466 = vst.msk [vmem:[%s552_s22 + $0x58] sm:$0xff] %vm177_vm1, %v314_v23 }
  0xab   : > { %v342_v24 = vpop.f32.mrf.mxu2  ;;  %v370_v25 = vpop.f32.mrf.mxu3 }
  0xac   : > { %471 = vst.msk [vmem:[%s552_s22 + $0x68] sm:$0xff] %vm177_vm1, %v342_v24 }
  0xad   : > { %476 = vst.msk [vmem:[%s552_s22 + $0x78] sm:$0xff] %vm177_vm1, %v370_v25 }
  0xae PF: > { %s12_s9 = sadd.s32 1, %s495_s9  }
  0xaf   : > { %p9_p4 = scmp.ge.s32.totalorder %s12_s9, 4  }
  0xb1   :  { %11 = sbr.rel (!%p9_p4) target bundleno = 1 (0x1), region = 72 }

</bundles_post_ra>
